<compile_context>
chip_gen: v7x
topology: tpu7x:2x2x1
jax: 0.10.0
libtpu: 0.0.40
codegen_flags: <defaults>
</compile_context>

<pallas_src>
import functools
import math

import jax
import jax.numpy as jnp
from jax import lax
from jax.experimental import pallas as pl
from jax.experimental.pallas import tpu as pltpu


# ----------------------------------------------------------------------------
# Small helpers
# ----------------------------------------------------------------------------

def _cdiv(a, b):
    return (a + b - 1) // b


def _round_up(a, m):
    return _cdiv(a, m) * m


def _round_down(a, m):
    return (a // m) * m


def _sublane_multiple(dtype) -> int:
    # Packed sublane minimum: 8 for 4-byte, 16 for 2-byte, 32 for 1-byte dtypes.
    itemsize = jnp.dtype(dtype).itemsize
    return max(8, 32 // max(1, itemsize))


def _hw_params():
    """Returns (target_block_bytes, vmem_limit_bytes, single_pass_block_ceiling).

    Generation-aware: v7x-class chips (64 MiB VMEM, ~3.2 TB/s HBM) want larger
    blocks to amortize per-grid-step overhead; v5e/v6e are already at ~85% of
    roofline with 2 MiB blocks.
    """
    try:
        info = pltpu.get_tpu_info()
        vmem = int(getattr(info, "vmem_capacity_bytes", 0) or 0)
    except Exception:  # non-TPU / interpret mode / old runtime
        vmem = 0
    if vmem >= 100 * 1024 * 1024:          # v5e / v6e / v5p class (128 MiB VMEM)
        target = 2 * 1024 * 1024
        limit = 64 * 1024 * 1024
    elif vmem > 0:                          # v7x class (64 MiB) or smaller
        limit = min(48 * 1024 * 1024, (vmem * 3) // 4)
        target = min(4 * 1024 * 1024, limit // 8)
    else:                                   # unknown backend: conservative
        target = 2 * 1024 * 1024
        limit = 32 * 1024 * 1024
    return target, limit, limit // 8


def _split_block(extent, block, align):
    """Clamp an `align`-multiple block so the grid over `extent` has >=2 steps
    whenever that is legal (v7x shards 'parallel' grid steps across 2 TCs)."""
    if extent <= align:
        return extent                      # full extent (always legal)
    block = max(align, _round_down(min(block, extent), align))
    two_step = _round_up(_cdiv(extent, 2), align)
    return min(block, two_step)


# ----------------------------------------------------------------------------
# Single-pass kernels (full reduction extent resident in the block)
# ----------------------------------------------------------------------------

def _divmax_lane_kernel(x_ref, o_ref):
    """Reduce over the last (lane) axis."""
    x = x_ref[...].astype(jnp.float32)
    m = jnp.max(x, axis=-1, keepdims=True)
    o_ref[...] = (x * pl.reciprocal(m, approx=False)).astype(o_ref.dtype)


def _divmax_lane_folded_kernel(x_ref, o_ref, *, groups, width):
    """Block is (rb, groups*width): `groups` logical rows of length `width`
    folded into the lane axis so loads/stores stay 128-lane dense."""
    x = x_ref[...].astype(jnp.float32)
    pieces = []
    for g in range(groups):                              # static unroll, g <= 16
        seg = x[:, g * width:(g + 1) * width]
        m = jnp.max(seg, axis=-1, keepdims=True)
        pieces.append(seg * pl.reciprocal(m, approx=False))
    o_ref[...] = jnp.concatenate(pieces, axis=-1).astype(o_ref.dtype)


def _divmax_sublane_kernel(x_ref, o_ref):
    """Reduce over axis -2 (sublanes); lane axis untouched."""
    x = x_ref[...].astype(jnp.float32)
    m = jnp.max(x, axis=-2, keepdims=True)
    o_ref[...] = (x * pl.reciprocal(m, approx=False)).astype(o_ref.dtype)


def _divmax_sublane_folded_kernel(x_ref, o_ref, *, groups, width):
    """Block is (pb, R//groups, groups*width): part of the reduction axis R is
    folded into lanes; reduce over sublanes and over the lane segments."""
    x = x_ref[...].astype(jnp.float32)
    segs = [x[:, :, g * width:(g + 1) * width] for g in range(groups)]
    m = segs[0].max(axis=1, keepdims=True)
    for s in segs[1:]:
        m = jnp.maximum(m, s.max(axis=1, keepdims=True))
    inv = pl.reciprocal(m, approx=False)
    o_ref[...] = jnp.concatenate([s * inv for s in segs], axis=-1).astype(o_ref.dtype)


# ----------------------------------------------------------------------------
# Two-pass kernels (reduction extent tiled; running max + scale)
# ----------------------------------------------------------------------------

def _rowmax_kernel(x_ref, m_ref, *, red_size, red_block):
    """Running max over the tiled last (lane) axis; out block resident over k."""
    k = pl.program_id(1)
    x = x_ref[...].astype(jnp.float32)
    lane = lax.broadcasted_iota(jnp.int32, x.shape, 1)
    valid = (k * red_block + lane) < red_size            # mask ragged tail tile
    part = jnp.max(jnp.where(valid, x, -jnp.inf), axis=-1, keepdims=True)

    @pl.when(k == 0)
    def _():
        m_ref[...] = part

    @pl.when(k > 0)
    def _():
        m_ref[...] = jnp.maximum(m_ref[...], part)


def _colmax_kernel(x_ref, m_ref, *, red_size, red_block):
    """Running max over the tiled sublane axis (axis 1)."""
    r = pl.program_id(2)
    x = x_ref[...].astype(jnp.float32)
    row = lax.broadcasted_iota(jnp.int32, x.shape, 1)
    valid = (r * red_block + row) < red_size
    part = jnp.max(jnp.where(valid, x, -jnp.inf), axis=1, keepdims=True)

    @pl.when(r == 0)
    def _():
        m_ref[...] = part

    @pl.when(r > 0)
    def _():
        m_ref[...] = jnp.maximum(m_ref[...], part)


def _scale_kernel(x_ref, m_ref, o_ref):
    """o = x / m with m broadcast along the reduced axis (2-D or 3-D blocks)."""
    x = x_ref[...].astype(jnp.float32)
    inv = pl.reciprocal(m_ref[...], approx=False)
    o_ref[...] = (x * inv).astype(o_ref.dtype)


# ----------------------------------------------------------------------------
# dim == last axis
# ----------------------------------------------------------------------------

def _divide_max_last_two_pass(x2, target, vmem_limit):
    """x2: [rows, D] with D too large to keep resident: max pass then scale pass."""
    rows, D = x2.shape
    dtype = x2.dtype
    itemsize = jnp.dtype(dtype).itemsize
    sub = _sublane_multiple(dtype)

    row_block = sub
    d_block = max(128, _round_down(target // max(1, row_block * itemsize), 128))
    if d_block >= D:
        d_block = D
    grid = (_cdiv(rows, row_block), _cdiv(D, d_block))

    maxes = pl.pallas_call(
        functools.partial(_rowmax_kernel, red_size=D, red_block=d_block),
        out_shape=jax.ShapeDtypeStruct((rows, 1), jnp.float32),
        grid_spec=pltpu.PrefetchScalarGridSpec(
            num_scalar_prefetch=0,
            grid=grid,
            in_specs=[pl.BlockSpec((row_block, d_block), lambda i, k: (i, k))],
            out_specs=pl.BlockSpec((row_block, 1), lambda i, k: (i, 0)),
        ),
        compiler_params=pltpu.CompilerParams(
            dimension_semantics=("parallel", "arbitrary"),
            vmem_limit_bytes=vmem_limit,
        ),
    )(x2)

    return pl.pallas_call(
        _scale_kernel,
        out_shape=jax.ShapeDtypeStruct((rows, D), dtype),
        grid_spec=pltpu.PrefetchScalarGridSpec(
            num_scalar_prefetch=0,
            grid=grid,
            in_specs=[pl.BlockSpec((row_block, d_block), lambda i, k: (i, k)),
                      pl.BlockSpec((row_block, 1), lambda i, k: (i, 0))],
            out_specs=pl.BlockSpec((row_block, d_block), lambda i, k: (i, k)),
        ),
        compiler_params=pltpu.CompilerParams(
            dimension_semantics=("parallel", "parallel"),
            vmem_limit_bytes=vmem_limit,
        ),
    )(x2, maxes)


def _divide_max_last(x2, target, vmem_limit, ceiling):
    """x2: [rows, D], reduce over D (lanes)."""
    rows, D = x2.shape
    dtype = x2.dtype
    itemsize = jnp.dtype(dtype).itemsize
    sub = _sublane_multiple(dtype)

    # (a) Narrow D: fold whole rows into lanes (free reshape) so stores are
    #     128-lane dense instead of masked vst.msk partial stores.
    if D < 128:
        g = 128 // math.gcd(D, 128)                      # smallest g with g*D % 128 == 0
        if g <= 16 and rows % g == 0:
            lanes = g * D
            rows_f = rows // g
            # Modest blocks here: the (width<128) intermediates of the
            # segmented max cost a few x the block size in VMEM.
            blk_cap = (1024 * 1024) if g <= 8 else (512 * 1024)
            row_block = max(sub, _round_down(blk_cap // (lanes * itemsize), sub))
            row_block = _split_block(rows_f, row_block, sub)
            grid = (_cdiv(rows_f, row_block),)
            out = pl.pallas_call(
                functools.partial(_divmax_lane_folded_kernel, groups=g, width=D),
                out_shape=jax.ShapeDtypeStruct((rows_f, lanes), dtype),
                grid_spec=pltpu.PrefetchScalarGridSpec(
                    num_scalar_prefetch=0,
                    grid=grid,
                    in_specs=[pl.BlockSpec((row_block, lanes), lambda i: (i, 0))],
                    out_specs=pl.BlockSpec((row_block, lanes), lambda i: (i, 0)),
                ),
                compiler_params=pltpu.CompilerParams(
                    dimension_semantics=("parallel",),
                    vmem_limit_bytes=vmem_limit,
                ),
            )(x2.reshape(rows_f, lanes))
            return out.reshape(rows, D)

    # (b) Very wide D: even a minimal (sub, D) block blows the VMEM budget ->
    #     tile the reduction extent in two passes.
    if sub * D * itemsize > ceiling:
        return _divide_max_last_two_pass(x2, target, vmem_limit)

    # (c) Plain streaming path: block (row_block, D).
    row_bytes = D * itemsize
    row_block = max(sub, _round_down(target // max(1, row_bytes), sub))
    row_block = _split_block(rows, row_block, sub)
    grid = (_cdiv(rows, row_block),)
    return pl.pallas_call(
        _divmax_lane_kernel,
        out_shape=jax.ShapeDtypeStruct((rows, D), dtype),
        grid_spec=pltpu.PrefetchScalarGridSpec(
            num_scalar_prefetch=0,
            grid=grid,
            in_specs=[pl.BlockSpec((row_block, D), lambda i: (i, 0))],
            out_specs=pl.BlockSpec((row_block, D), lambda i: (i, 0)),
        ),
        compiler_params=pltpu.CompilerParams(
            dimension_semantics=("parallel",),
            vmem_limit_bytes=vmem_limit,
        ),
    )(x2)


# ----------------------------------------------------------------------------
# dim != last axis: x viewed as (pre, R, post), reduce over R
# ----------------------------------------------------------------------------

def _divide_max_middle_two_pass(x3, target, vmem_limit):
    """x3: [pre, R, post] with R too large to keep resident."""
    pre, R, post = x3.shape
    dtype = x3.dtype
    itemsize = jnp.dtype(dtype).itemsize

    if post < 128:
        post_block = post
    else:
        post_block = min(_round_down(post, 128), 512)
    r_block = max(8, _round_down(target // max(1, post_block * itemsize), 8))
    if r_block >= R:
        r_block = R
    grid = (pre, _cdiv(post, post_block), _cdiv(R, r_block))

    maxes = pl.pallas_call(
        functools.partial(_colmax_kernel, red_size=R, red_block=r_block),
        out_shape=jax.ShapeDtypeStruct((pre, 1, post), jnp.float32),
        grid_spec=pltpu.PrefetchScalarGridSpec(
            num_scalar_prefetch=0,
            grid=grid,
            in_specs=[pl.BlockSpec((1, r_block, post_block),
                                   lambda i, j, r: (i, r, j))],
            out_specs=pl.BlockSpec((1, 1, post_block), lambda i, j, r: (i, 0, j)),
        ),
        compiler_params=pltpu.CompilerParams(
            dimension_semantics=("parallel", "parallel", "arbitrary"),
            vmem_limit_bytes=vmem_limit,
        ),
    )(x3)

    return pl.pallas_call(
        _scale_kernel,
        out_shape=jax.ShapeDtypeStruct((pre, R, post), dtype),
        grid_spec=pltpu.PrefetchScalarGridSpec(
            num_scalar_prefetch=0,
            grid=grid,
            in_specs=[pl.BlockSpec((1, r_block, post_block),
                                   lambda i, j, r: (i, r, j)),
                      pl.BlockSpec((1, 1, post_block), lambda i, j, r: (i, 0, j))],
            out_specs=pl.BlockSpec((1, r_block, post_block),
                                   lambda i, j, r: (i, r, j)),
        ),
        compiler_params=pltpu.CompilerParams(
            dimension_semantics=("parallel", "parallel", "parallel"),
            vmem_limit_bytes=vmem_limit,
        ),
    )(x3, maxes)


def _divide_max_middle(x3, target, vmem_limit, ceiling):
    """x3: [pre, R, post], reduce over R (sublanes); post stays on lanes."""
    pre, R, post = x3.shape
    dtype = x3.dtype
    itemsize = jnp.dtype(dtype).itemsize

    # Minimum legal single-pass block keeps the whole reduction extent R
    # resident; if even that blows the VMEM budget, tile R in two passes.
    min_block_bytes = R * min(post, 128) * itemsize
    if min_block_bytes > ceiling:
        return _divide_max_middle_two_pass(x3, target, vmem_limit)

    # Lane-density fold for small post (avoid masked partial stores): fold
    # part of R into the lane axis with a free reshape.
    if post < 128:
        g = 128 // math.gcd(post, 128)
        blk_cap = (1024 * 1024) if g <= 8 else (512 * 1024)
        if g <= 16 and R % g == 0 and min_block_bytes <= blk_cap:
            lanes = g * post
            rg = R // g
            slab = rg * lanes * itemsize
            pre_block = max(1, min(pre, blk_cap // max(1, slab)))
            if pre > 1 and _cdiv(pre, pre_block) < 2:     # feed both v7x TCs
                pre_block = _cdiv(pre, 2)
            grid = (_cdiv(pre, pre_block),)
            out = pl.pallas_call(
                functools.partial(_divmax_sublane_folded_kernel,
                                  groups=g, width=post),
                out_shape=jax.ShapeDtypeStruct((pre, rg, lanes), dtype),
                grid_spec=pltpu.PrefetchScalarGridSpec(
                    num_scalar_prefetch=0,
                    grid=grid,
                    in_specs=[pl.BlockSpec((pre_block, rg, lanes),
                                           lambda i: (i, 0, 0))],
                    out_specs=pl.BlockSpec((pre_block, rg, lanes),
                                           lambda i: (i, 0, 0)),
                ),
                compiler_params=pltpu.CompilerParams(
                    dimension_semantics=("parallel",),
                    vmem_limit_bytes=vmem_limit,
                ),
            )(x3.reshape(pre, rg, lanes))
            return out.reshape(pre, R, post)

    # Plain single-pass: block (pre_block, R, post_block).
    if post < 128:
        post_block = post
    else:
        lane_budget = target // max(1, R * itemsize)
        post_block = post if lane_budget >= post else max(128, _round_down(lane_budget, 128))
    slab = R * post_block * itemsize
    pre_block = max(1, min(pre, target // max(1, slab)))
    if _cdiv(pre, pre_block) * _cdiv(post, post_block) < 2:
        if pre > 1:
            pre_block = _cdiv(pre, 2)
        elif post_block == post and post >= 256:
            post_block = _round_up(_cdiv(post, 2), 128)
    grid = (_cdiv(pre, pre_block), _cdiv(post, post_block))
    return pl.pallas_call(
        _divmax_sublane_kernel,
        out_shape=jax.ShapeDtypeStruct((pre, R, post), dtype),
        grid_spec=pltpu.PrefetchScalarGridSpec(
            num_scalar_prefetch=0,
            grid=grid,
            in_specs=[pl.BlockSpec((pre_block, R, post_block),
                                   lambda i, j: (i, 0, j))],
            out_specs=pl.BlockSpec((pre_block, R, post_block),
                                   lambda i, j: (i, 0, j)),
        ),
        compiler_params=pltpu.CompilerParams(
            dimension_semantics=("parallel", "parallel"),
            vmem_limit_bytes=vmem_limit,
        ),
    )(x3)


# ----------------------------------------------------------------------------
# Public entry point
# ----------------------------------------------------------------------------

def divide_max(x, dim=-1):
    """Pallas TPU equivalent of DivideMax(dim): x / x.amax(dim, keepdim=True).

    (.detach() on the max is a forward-pass no-op.)
    """
    ndim = x.ndim
    dim = dim % ndim
    shape = x.shape
    target, vmem_limit, ceiling = _hw_params()

    if dim == ndim - 1:
        D = shape[-1]
        rows = 1
        for s in shape[:-1]:
            rows *= s
        out = _divide_max_last(x.reshape(rows, D), target, vmem_limit, ceiling)
        return out.reshape(shape)

    # Non-last reduction axis: free reshape only (no transpose pass over HBM);
    # the kernel reduces over the sublane axis.
    pre = 1
    for s in shape[:dim]:
        pre *= s
    R = shape[dim]
    post = 1
    for s in shape[dim + 1:]:
        post *= s
    out = _divide_max_middle(x.reshape(pre, R, post), target, vmem_limit, ceiling)
    return out.reshape(shape)


class DivideMax:
    """Thin module-style wrapper matching the PyTorch spec."""

    def __init__(self, dim):
        self.dim = dim

    def __call__(self, x):
        return divide_max(x, self.dim)


# ----------------------------------------------------------------------------
# Self-test
# ----------------------------------------------------------------------------

if __name__ == "__main__":
    def _ref(x, dim):
        return x / jnp.max(x, axis=dim, keepdims=True)

    key = jax.random.PRNGKey(0)
    # Small transformer-ish shape: (batch=2, seq=8, hidden=32)
    x = jax.random.normal(key, (2, 8, 32), dtype=jnp.float32) + 2.0

    # dim = -1 (lane-reduce, small-D folded lane-dense path)
    y = jax.block_until_ready(divide_max(x, dim=-1))
    assert y.shape == x.shape and y.dtype == x.dtype
    assert jnp.allclose(y, _ref(x, -1), atol=1e-6, rtol=1e-5), "dim=-1 mismatch"

    # dim = 1 (sublane-reduce, small-post folded path)
    y1 = jax.block_until_ready(divide_max(x, dim=1))
    assert jnp.allclose(y1, _ref(x, 1), atol=1e-6, rtol=1e-5), "dim=1 mismatch"

    # dim = 0 (sublane-reduce, plain path, pre == 1)
    y0 = jax.block_until_ready(divide_max(x, dim=0))
    assert jnp.allclose(y0, _ref(x, 0), atol=1e-6, rtol=1e-5), "dim=0 mismatch"

    # Larger shape: multi-step grid, ragged last block, lane-dense D.
    xb = jax.random.normal(jax.random.PRNGKey(1), (3, 1000, 256),
                           dtype=jnp.float32) + 2.0
    yb = jax.block_until_ready(divide_max(xb, dim=-1))
    assert jnp.allclose(yb, _ref(xb, -1), atol=1e-6, rtol=1e-5), "big dim=-1 mismatch"
    yb1 = jax.block_until_ready(divide_max(xb, dim=1))
    assert jnp.allclose(yb1, _ref(xb, 1), atol=1e-6, rtol=1e-5), "big dim=1 mismatch"

    # bf16 input: in-kernel f32 compute keeps the error at bf16 rounding level.
    xh = (jax.random.normal(jax.random.PRNGKey(2), (2, 8, 32)) + 2.0).astype(jnp.bfloat16)
    yh = jax.block_until_ready(divide_max(xh, dim=-1))
    refh = _ref(xh.astype(jnp.float32), -1)
    assert yh.dtype == jnp.bfloat16
    assert jnp.allclose(yh.astype(jnp.float32), refh, atol=2e-2, rtol=2e-2), "bf16 mismatch"

    # Exercise the two-pass (reduction-extent-tiled) fallbacks directly with a
    # tiny block budget so the running-max + masking paths actually run.
    x2 = xb.reshape(-1, 256)
    y2p = jax.block_until_ready(
        _divide_max_last_two_pass(x2, 4 * 1024, 32 * 1024 * 1024))
    assert jnp.allclose(y2p, _ref(x2, -1), atol=1e-6, rtol=1e-5), "two-pass lane mismatch"

    y3p = jax.block_until_ready(
        _divide_max_middle_two_pass(xb, 64 * 1024, 32 * 1024 * 1024))
    assert jnp.allclose(y3p, _ref(xb, 1), atol=1e-6, rtol=1e-5), "two-pass sublane mismatch"

    print("KERNEL_OK")
</pallas_src>

<mosaic_0001>
module attributes {stable_mosaic.version = 11 : i64} {
  func.func @_divmax_lane_folded_kernel(%arg0: i32, %arg1: memref<4x128xf32, #tpu.memory_space<vmem>>, %arg2: memref<4x128xf32, #tpu.memory_space<vmem>>) attributes {dimension_semantics = [#tpu.dimension_semantics<parallel>], iteration_bounds = array<i64: 1>, scalar_prefetch = 0 : i64, scratch_operands = 0 : i64, tpu.core_type = #tpu.core_type<tc>, window_params = [{transform_indices = @transform_0, window_bounds = array<i64: 4, 128>}, {transform_indices = @transform_1, window_bounds = array<i64: 4, 128>}]} {
    %c0 = arith.constant 0 : index
    %c0_0 = arith.constant 0 : index
    %0 = vector.load %arg1[%c0, %c0_0] : memref<4x128xf32, #tpu.memory_space<vmem>>, vector<4x128xf32>
    %1 = vector.extract_strided_slice %0 {offsets = [0, 0], sizes = [4, 32], strides = [1, 1]} : vector<4x128xf32> to vector<4x32xf32>
    %cst = arith.constant dense<0xFF800000> : vector<4xf32>
    %2 = vector.multi_reduction <maximumf>, %1, %cst [1] : vector<4x32xf32> to vector<4xf32>
    %3 = vector.shape_cast %2 : vector<4xf32> to vector<4x1xf32>
    %4 = tpu.reciprocal %3 : vector<4x1xf32> -> vector<4x1xf32>
    %5 = vector.broadcast %4 : vector<4x1xf32> to vector<4x32xf32>
    %6 = arith.mulf %1, %5 : vector<4x32xf32>
    %7 = vector.extract_strided_slice %0 {offsets = [0, 32], sizes = [4, 32], strides = [1, 1]} : vector<4x128xf32> to vector<4x32xf32>
    %cst_1 = arith.constant dense<0xFF800000> : vector<4xf32>
    %8 = vector.multi_reduction <maximumf>, %7, %cst_1 [1] : vector<4x32xf32> to vector<4xf32>
    %9 = vector.shape_cast %8 : vector<4xf32> to vector<4x1xf32>
    %10 = tpu.reciprocal %9 : vector<4x1xf32> -> vector<4x1xf32>
    %11 = vector.broadcast %10 : vector<4x1xf32> to vector<4x32xf32>
    %12 = arith.mulf %7, %11 : vector<4x32xf32>
    %13 = vector.extract_strided_slice %0 {offsets = [0, 64], sizes = [4, 32], strides = [1, 1]} : vector<4x128xf32> to vector<4x32xf32>
    %cst_2 = arith.constant dense<0xFF800000> : vector<4xf32>
    %14 = vector.multi_reduction <maximumf>, %13, %cst_2 [1] : vector<4x32xf32> to vector<4xf32>
    %15 = vector.shape_cast %14 : vector<4xf32> to vector<4x1xf32>
    %16 = tpu.reciprocal %15 : vector<4x1xf32> -> vector<4x1xf32>
    %17 = vector.broadcast %16 : vector<4x1xf32> to vector<4x32xf32>
    %18 = arith.mulf %13, %17 : vector<4x32xf32>
    %19 = vector.extract_strided_slice %0 {offsets = [0, 96], sizes = [4, 32], strides = [1, 1]} : vector<4x128xf32> to vector<4x32xf32>
    %cst_3 = arith.constant dense<0xFF800000> : vector<4xf32>
    %20 = vector.multi_reduction <maximumf>, %19, %cst_3 [1] : vector<4x32xf32> to vector<4xf32>
    %21 = vector.shape_cast %20 : vector<4xf32> to vector<4x1xf32>
    %22 = tpu.reciprocal %21 : vector<4x1xf32> -> vector<4x1xf32>
    %23 = vector.broadcast %22 : vector<4x1xf32> to vector<4x32xf32>
    %24 = arith.mulf %19, %23 : vector<4x32xf32>
    %25 = tpu.concatenate %6, %12, %18, %24 in 1 : vector<4x32xf32>, vector<4x32xf32>, vector<4x32xf32>, vector<4x32xf32> -> vector<4x128xf32>
    %c0_4 = arith.constant 0 : index
    %c0_5 = arith.constant 0 : index
    %26 = vector.load %arg2[%c0_4, %c0_5] : memref<4x128xf32, #tpu.memory_space<vmem>>, vector<4x128xf32>
    tpu.vector_store %arg2[%c0_4, %c0_5], %25 {strides = array<i32>} : memref<4x128xf32, #tpu.memory_space<vmem>>, vector<4x128xf32>,
    return
  }
  func.func @transform_0(%arg0: i32) -> (i32, i32) {
    %c0_i32 = arith.constant 0 : i32
    %c0_i32_0 = arith.constant 0 : i32
    return %arg0, %c0_i32 : i32, i32
  }
  func.func @transform_1(%arg0: i32) -> (i32, i32) {
    %c0_i32 = arith.constant 0 : i32
    %c0_i32_0 = arith.constant 0 : i32
    return %arg0, %c0_i32 : i32, i32
  }
}

</mosaic_0001>

<bundles_post_ra>
// kernel: tpu_custom_call.1
= control target key start
LH: loop header
LB: loop body
LE: loop exit
PB: predicated region body
PF: predicated region fallthrough
CT: control target
= control target key end

     0   :  { %6 = vsyncpa [#allocation3], 0  ;;  %s162_s0 = inlined_call_operand.hbm [shape: f32[4,128], index: 0, kind: input, shape index: {}]   ;;  %s163_s1 = inlined_call_operand.hbm [shape: f32[4,128], index: 1, kind: output, shape index: {}]  }
   0x1   :  { %7 = vsyncpa [#allocation4], 0  ;;  %s126_s6 = smov [#allocation2]   ;;  %s78_s10 = scalar_lea.hbm %s162_s0, 64 }
   0x2   :  { %s14_s7 = sshll.u32 %s126_s6, 4  ;;  %p79_p0 = scmp.ne.s32.totalorder %s162_s0, %s78_s10  ;;  %s15_s7 = int_to_ptr.vmem [resolvable:$true] %s14_s7 }
   0x3   :  { %p82_p1 = scmp.lt.u32.totalorder %s78_s10, %s162_s0 }
   0x5   :  { %p84_p2 = pnand %p82_p1, %p79_p0 }
   0x7   :  { %87 = shalt.err (!%p84_p2)
}
   0x8   :  { %s88_s15 = scalar_lea.vmem %s15_s7, 64  ;;  %p93_p4 = scmp.lt.s32.totalorder %s15_s7, %s15_s7 }
   0x9   :  { %p89_p3 = scmp.ne.s32.totalorder %s15_s7, %s88_s15  ;;  %p94_p5 = scmp.lt.s32.totalorder %s88_s15, %s88_s15 }
   0xb   :  { %p95_p6 = por %p94_p5, %p93_p4 }
   0xd   :  { %p96_p7 = pnand %p95_p6, %p89_p3 }
   0xf   :  { %99 = shalt.err (!%p96_p7)
}
  0x10   :  { %17 = dma.hbm_to_vmem [thread:$0]  %s162_s0, 64, %s15_s7, [#allocation3]  }
  0x11   :  { %122 = dma.done.wait [#allocation3], 64  }
  0x12   :  { %123 = vsyncadd [#allocation3], 4294967232  ;;  %vm22_vm0 = vcmask 257024   ;;  %vm34_vm1 = vcmask 781824   ;;  %v21_v0 = vld [vmem:[#allocation2] sm:$0xf] }
  0x13   :  { %vm28_vm2 = vcmask 519424   ;;  %vm40_vm3 = vcmask 1044224   ;;  %v23_v1 = vsel %vm22_vm0, %v21_v0, -inf  ;;  %v35_v2 = vsel %vm34_vm1, %v21_v0, -inf  ;;  %s127_s0 = smov [#allocation5]  }
  0x14   :  { %24 = vmax.xlane.f32.xlu0 %v23_v1  ;;  %36 = vmax.xlane.f32.xlu1 %v35_v2  ;;  %v29_v3 = vsel %vm28_vm2, %v21_v0, -inf  ;;  %v41_v4 = vsel %vm40_vm3, %v21_v0, -inf  ;;  %vm46_vm4 = vcmask 261120   ;;  %vm48_vm5 = vcmask 523264   ;;  %s59_s18 = sshll.u32 %s127_s0, 4  ;;  %s60_s18 = int_to_ptr.vmem [resolvable:$true] %s59_s18 }
  0x15   :  { %vm50_vm6 = vcmask 785408   ;;  %s100_s19 = scalar_lea.vmem %s60_s18, 64  ;;  %p105_p9 = scmp.lt.s32.totalorder %s60_s18, %s60_s18 }
  0x16   :  { %p101_p8 = scmp.ne.s32.totalorder %s60_s18, %s100_s19  ;;  %p106_p10 = scmp.lt.s32.totalorder %s100_s19, %s100_s19 }
  0x18   :  { %30 = vmax.xlane.f32.xlu0 %v29_v3  ;;  %42 = vmax.xlane.f32.xlu1 %v41_v4  ;;  %p107_p11 = por %p106_p10, %p105_p9 }
  0x1a   :  { %p108_p12 = pnand %p107_p11, %p101_p8 }
  0xa1   :  { %v25_v5 = vpop.xlane.xlu0 %24  ;;  %v37_v6 = vpop.xlane.xlu1 %36 }
  0xa2   :  { %70 = vrcp.f32 %v25_v5 }
  0xa3   :  { %72 = vrcp.f32 %v37_v6 }
  0xa5   :  { %v31_v7 = vpop.xlane.xlu0 %30  ;;  %v43_v8 = vpop.xlane.xlu1 %42 }
  0xa6   :  { %74 = vrcp.f32 %v31_v7 }
  0xa7   :  { %76 = vrcp.f32 %v43_v8 }
  0xac   :  { %v71_v9 = vpop.eup %70 }
  0xad   :  { %v73_v10 = vpop.eup %72  ;;  %v27_v13 = vmul.f32 %v71_v9, %v21_v0 }
  0xae   :  { %v39_v15 = vmul.f32 %v73_v10, %v21_v0 }
  0xb0   :  { %v75_v11 = vpop.eup %74 }
  0xb1   :  { %v77_v12 = vpop.eup %76  ;;  %v33_v14 = vmul.f32 %v75_v11, %v21_v0 }
  0xb2   :  { %v45_v16 = vmul.f32 %v77_v12, %v21_v0 }
  0xb3   :  { %v47_v17 = vsel %vm46_vm4, %v27_v13, %v33_v14 }
  0xb4   :  { %v49_v18 = vsel %vm48_vm5, %v47_v17, %v39_v15 }
  0xb5   :  { %v51_v19 = vsel %vm50_vm6, %v49_v18, %v45_v16 }
  0xb6   :  { %52 = vst [vmem:[#allocation5] sm:$0xf] %v51_v19 }
  0xb7   :  { %111 = shalt.err (!%p108_p12)
}
  0xb8   :  { %s112_s22 = scalar_lea.hbm %s163_s1, 64 }
  0xb9   :  { %p113_p13 = scmp.ne.s32.totalorder %s163_s1, %s112_s22  ;;  %p116_p0 = scmp.lt.u32.totalorder %s112_s22, %s163_s1 }
  0xbb   :  { %p118_p1 = pnand %p116_p0, %p113_p13 }
  0xbd   :  { %121 = shalt.err (!%p118_p1)
}
  0xbe   :  { %62 = dma.vmem_to_hbm [thread:$0]  %s60_s18, 64, %s163_s1, [#allocation4]  }
  0xbf   :  { %124 = dma.done.wait [#allocation4], 64  }
  0xc0   :  { %125 = vsyncadd [#allocation4], 4294967232 }
  0xc1   :  { %66 = vsyncpa [#allocation3], 1 }
  0xc2   :  { %67 = vsyncpa [#allocation4], 1 }

</bundles_post_ra>
